<compile_context>
chip_gen: v5e
topology: v5e:2x2
jax: 0.10.0
libtpu: 0.0.40
codegen_flags: <defaults>
</compile_context>

<pallas_src>
import jax
import jax.numpy as jnp
from jax.experimental import pallas as pl
from jax.experimental.pallas import tpu as pltpu


# --------------------------- activations ---------------------------
def _lecun(x):
    return 1.7159 * jnp.tanh(0.666 * x)


_ACT = {
    "silu": jax.nn.silu,
    "relu": lambda x: jnp.maximum(x, 0.0),
    "tanh": jnp.tanh,
    # approximate (tanh) GELU goes to the otherwise-idle EUP slot instead of a VALU erf
    # polynomial; matches nn.GELU to ~1e-3.
    "gelu": lambda x: jax.nn.gelu(x, approximate=True),
    "lecun": _lecun,
}


def _round_up(n, m):
    return ((n + m - 1) // m) * m


def _pick_batch_tile(B):
    """Batch tile: big tiles for large B (MXU is up to 256-deep on v6e/v7x) while keeping
    >= 2 grid steps so the 'parallel' axis can shard across v7x's two TensorCores."""
    bp8 = _round_up(B, 8)
    if bp8 <= 128:
        return bp8
    half = _round_up((bp8 + 1) // 2, 8)
    return min(512, half)


def _vmem_limit(weight_bytes, io_tile_bytes):
    # weights are single-buffered; activation tiles are double-buffered by the pipeline.
    est = weight_bytes + 2 * io_tile_bytes + (4 << 20)
    # generous headroom for compiler temps; clamp to v7x's 64 MiB physical VMEM.
    return int(min(max(2 * est, 32 << 20), 64 << 20))


def _const_spec(shape, index_map):
    """Constant-index parameter block: request single buffering (never re-fetched)."""
    try:
        return pl.BlockSpec(shape, index_map, pipeline_mode=pl.Buffered(1))
    except (TypeError, AttributeError):
        return pl.BlockSpec(shape, index_map)


# --------------------------- one-time host-side weight packing ---------------------------
def prepare_params(params, input_size, hidden_size, hparams, *, compute_dtype=jnp.bfloat16):
    """Pack CfcCell weights once into lane-dense, MXU-ready blocks.

    Weights are stored in `compute_dtype` (bf16 is the native MXU rate on v5e/v6e/v7x and
    halves weight HBM/VMEM traffic); biases stay f32 (added after the f32-accumulated dot).
    Zero padding is exact for this module: activation(0) == 0 for every supported
    activation, and padded output lanes are sliced off.
    """
    F, H = int(input_size), int(hidden_size)
    BU = int(hparams["backbone_units"])
    L = int(hparams["backbone_layers"])
    assert L >= 1, "backbone_layers must be >= 1"
    assert not hparams.get("minimal", False), "minimal CfC variant not implemented"

    Fp, Hp, BUp = _round_up(F, 128), _round_up(H, 128), _round_up(BU, 128)
    XW = F + H
    XWp = _round_up(XW, 128)
    f32 = jnp.float32

    def pad_w(a, rows, cols, dtype):
        a = jnp.asarray(a, f32)
        a = jnp.pad(a, ((0, rows - a.shape[0]), (0, cols - a.shape[1])))
        return a.astype(dtype)

    def pad_b(b, cols):
        b = jnp.asarray(b, f32).reshape(1, -1)
        return jnp.pad(b, ((0, 0), (0, cols - b.shape[1])))

    w1 = jnp.asarray(params["backbone"][0]["w"], f32)  # (F+H, BU)
    b1 = params["backbone"][0]["b"]

    packed = {
        # merged layer-0 weight for the single-step kernel (host concats [x, hx])
        "w0": pad_w(w1, XWp, BUp, compute_dtype),
        # split layer-0 weights for the sequence kernel (hidden state lives in VMEM)
        "w0x": pad_w(w1[:F], Fp, BUp, compute_dtype),
        "w0h": pad_w(w1[F:], Hp, BUp, compute_dtype),
        "b0": pad_b(b1, BUp),
        "hidden": [(pad_w(l["w"], BUp, BUp, compute_dtype), pad_b(l["b"], BUp))
                   for l in params["backbone"][1:]],
    }
    head_names = ("ff1", "ff2", "time_a", "time_b")
    packed["w_heads"] = jnp.concatenate(
        [pad_w(params[n]["w"], BUp, Hp, compute_dtype) for n in head_names], axis=1)
    packed["b_heads"] = jnp.concatenate(
        [pad_b(params[n]["b"], Hp) for n in head_names], axis=1)

    packed["meta"] = dict(
        F=F, H=H, BU=BU, L=L, Fp=Fp, Hp=Hp, BUp=BUp, XW=XW, XWp=XWp,
        activation=hparams["backbone_activation"],
        no_gate=bool(hparams.get("no_gate", False)),
        compute_dtype=compute_dtype,
    )
    return packed


# --------------------------- single-step kernel ---------------------------
def _make_cfc_step_kernel(n_hidden_layers, activation, no_gate, h_pad, compute_dtype):
    act = _ACT[activation]

    def kernel(*refs):
        it = iter(refs)
        x_ref, ts_ref = next(it), next(it)
        w0_ref, b0_ref = next(it), next(it)
        hidden = [(next(it), next(it)) for _ in range(n_hidden_layers)]
        wh_ref, bh_ref = next(it), next(it)
        out_ref = next(it)

        # backbone layer 0: single matmul on the host-concatenated [x, hx] tile (bf16 in,
        # f32 accumulate); element-wise math stays f32.
        h = jnp.dot(x_ref[...], w0_ref[...], preferred_element_type=jnp.float32)
        h = act(h + b0_ref[...])
        for w_ref, b_ref in hidden:
            h = act(jnp.dot(h.astype(compute_dtype), w_ref[...],
                            preferred_element_type=jnp.float32) + b_ref[...])

        # fused heads: one (TB, BUp) @ (BUp, 4*Hp) matmul; slices are (8,128)-tile-aligned.
        h4 = jnp.dot(h.astype(compute_dtype), wh_ref[...],
                     preferred_element_type=jnp.float32) + bh_ref[...]
        ff1 = jnp.tanh(h4[:, 0 * h_pad:1 * h_pad])
        ff2 = jnp.tanh(h4[:, 1 * h_pad:2 * h_pad])
        t_a = h4[:, 2 * h_pad:3 * h_pad]
        t_b = h4[:, 3 * h_pad:4 * h_pad]

        t_interp = jax.nn.sigmoid(t_a * ts_ref[...] + t_b)  # ts is lane-dense (TB, Hp)
        if no_gate:
            new_hidden = ff1 + t_interp * ff2
        else:
            new_hidden = ff1 * (1.0 - t_interp) + t_interp * ff2
        out_ref[...] = new_hidden.astype(out_ref.dtype)

    return kernel


def cfc_cell_forward(x, hx, ts, packed, *, batch_tile=None):
    """One CfcCell step. `packed` comes from prepare_params()."""
    meta = packed["meta"]
    F, H, Hp, XW, XWp = meta["F"], meta["H"], meta["Hp"], meta["XW"], meta["XWp"]
    cdt = meta["compute_dtype"]

    B = x.shape[0]
    TB = batch_tile if batch_tile is not None else _pick_batch_tile(B)
    Bp = _round_up(B, TB)

    # host-side concat of [x, hx], zero-padded lane-dense, stored in the MXU compute dtype
    xcat = jnp.concatenate([x.astype(jnp.float32), hx.astype(jnp.float32)], axis=1)
    xcat = jnp.pad(xcat, ((0, Bp - B), (0, XWp - XW))).astype(cdt)

    ts = jnp.asarray(ts, jnp.float32).reshape(-1)
    ts = jnp.broadcast_to(ts, (B,)) if ts.shape[0] == 1 else ts[:B]
    tsp = jnp.pad(ts.reshape(B, 1), ((0, Bp - B), (0, 0)))
    tsp = jnp.broadcast_to(tsp, (Bp, Hp))  # lane-dense -> plain VPU multiply in-kernel

    w_args = [packed["w0"], packed["b0"]]
    for w, b in packed["hidden"]:
        w_args += [w, b]
    w_args += [packed["w_heads"], packed["b_heads"]]

    weight_bytes = sum(int(a.size) * int(a.dtype.itemsize) for a in w_args)
    io_tile_bytes = TB * XWp * jnp.dtype(cdt).itemsize + 2 * TB * Hp * 4

    in_specs = [
        pl.BlockSpec((TB, XWp), lambda i: (i, 0)),
        pl.BlockSpec((TB, Hp), lambda i: (i, 0)),
    ]
    for a in w_args:
        in_specs.append(_const_spec(a.shape, lambda i: (0, 0)))

    kernel = _make_cfc_step_kernel(meta["L"] - 1, meta["activation"], meta["no_gate"],
                                   Hp, cdt)

    out = pl.pallas_call(
        kernel,
        out_shape=jax.ShapeDtypeStruct((Bp, Hp), jnp.float32),
        grid=(Bp // TB,),
        in_specs=in_specs,
        out_specs=pl.BlockSpec((TB, Hp), lambda i: (i, 0)),
        compiler_params=pltpu.CompilerParams(
            dimension_semantics=("parallel",),
            vmem_limit_bytes=_vmem_limit(weight_bytes, io_tile_bytes),
        ),
    )(xcat, tsp, *w_args)

    return out[:B, :H]


# --------------------------- fused multi-timestep kernel ---------------------------
def _make_cfc_seq_kernel(n_hidden_layers, activation, no_gate, h_pad, compute_dtype):
    act = _ACT[activation]

    def kernel(*refs):
        it = iter(refs)
        x_ref, ts_ref, hx0_ref = next(it), next(it), next(it)
        w0x_ref, w0h_ref, b0_ref = next(it), next(it), next(it)
        hidden = [(next(it), next(it)) for _ in range(n_hidden_layers)]
        wh_ref, bh_ref = next(it), next(it)
        out_ref = next(it)
        h_state = next(it)  # VMEM scratch: carries hx across the time axis

        @pl.when(pl.program_id(1) == 0)
        def _():
            h_state[...] = hx0_ref[...]

        hx = h_state[...]
        # layer 0: x_t @ W0x + hx @ W0h  (split weight; hx lives in VMEM, no concat)
        h = jnp.dot(x_ref[0], w0x_ref[...], preferred_element_type=jnp.float32)
        h = h + jnp.dot(hx.astype(compute_dtype), w0h_ref[...],
                        preferred_element_type=jnp.float32)
        h = act(h + b0_ref[...])
        for w_ref, b_ref in hidden:
            h = act(jnp.dot(h.astype(compute_dtype), w_ref[...],
                            preferred_element_type=jnp.float32) + b_ref[...])

        h4 = jnp.dot(h.astype(compute_dtype), wh_ref[...],
                     preferred_element_type=jnp.float32) + bh_ref[...]
        ff1 = jnp.tanh(h4[:, 0 * h_pad:1 * h_pad])
        ff2 = jnp.tanh(h4[:, 1 * h_pad:2 * h_pad])
        t_a = h4[:, 2 * h_pad:3 * h_pad]
        t_b = h4[:, 3 * h_pad:4 * h_pad]

        t_interp = jax.nn.sigmoid(t_a * ts_ref[0] + t_b)
        if no_gate:
            new_hidden = ff1 + t_interp * ff2
        else:
            new_hidden = ff1 * (1.0 - t_interp) + t_interp * ff2

        h_state[...] = new_hidden
        out_ref[0] = new_hidden.astype(out_ref.dtype)

    return kernel


def cfc_cell_sequence(xseq, hx0, tsseq, packed, *, batch_tile=None):
    """Fused T-step CfC rollout: grid = (batch_tiles, T). Weights stay VMEM-resident
    across the whole sequence (constant-index, single-buffered blocks) and the hidden
    state is carried in a VMEM scratch; returns all hidden states (T, B, H)."""
    meta = packed["meta"]
    F, H, Fp, Hp = meta["F"], meta["H"], meta["Fp"], meta["Hp"]
    cdt = meta["compute_dtype"]

    T, B, _ = xseq.shape
    TB = batch_tile if batch_tile is not None else _pick_batch_tile(B)
    Bp = _round_up(B, TB)

    xp = jnp.pad(xseq.astype(jnp.float32),
                 ((0, 0), (0, Bp - B), (0, Fp - F))).astype(cdt)
    hx0p = jnp.pad(hx0.astype(jnp.float32), ((0, Bp - B), (0, Hp - H)))

    tsseq = jnp.asarray(tsseq, jnp.float32)
    if tsseq.ndim == 1:
        tsseq = jnp.broadcast_to(tsseq.reshape(T, 1), (T, B))
    tsp = jnp.pad(tsseq[:, :B], ((0, 0), (0, Bp - B)))
    tsp = jnp.broadcast_to(tsp[:, :, None], (T, Bp, Hp))

    w_args = [packed["w0x"], packed["w0h"], packed["b0"]]
    for w, b in packed["hidden"]:
        w_args += [w, b]
    w_args += [packed["w_heads"], packed["b_heads"]]

    weight_bytes = sum(int(a.size) * int(a.dtype.itemsize) for a in w_args)
    io_tile_bytes = TB * Fp * jnp.dtype(cdt).itemsize + 3 * TB * Hp * 4

    in_specs = [
        pl.BlockSpec((1, TB, Fp), lambda i, t: (t, i, 0)),
        pl.BlockSpec((1, TB, Hp), lambda i, t: (t, i, 0)),
        pl.BlockSpec((TB, Hp), lambda i, t: (i, 0)),
    ]
    for a in w_args:
        in_specs.append(_const_spec(a.shape, lambda i, t: (0, 0)))

    kernel = _make_cfc_seq_kernel(meta["L"] - 1, meta["activation"], meta["no_gate"],
                                  Hp, cdt)

    out = pl.pallas_call(
        kernel,
        out_shape=jax.ShapeDtypeStruct((T, Bp, Hp), jnp.float32),
        grid=(Bp // TB, T),
        in_specs=in_specs,
        out_specs=pl.BlockSpec((1, TB, Hp), lambda i, t: (t, i, 0)),
        scratch_shapes=[pltpu.VMEM((TB, Hp), jnp.float32)],
        compiler_params=pltpu.CompilerParams(
            dimension_semantics=("parallel", "arbitrary"),
            vmem_limit_bytes=_vmem_limit(weight_bytes, io_tile_bytes),
        ),
    )(xp, tsp, hx0p, *w_args)

    return out[:, :B, :H]


# --------------------------- parameter init (mirrors nn.Linear defaults) ---------------------------
def init_params(key, input_size, hidden_size, hparams):
    BU = hparams["backbone_units"]
    L = hparams["backbone_layers"]
    keys = jax.random.split(key, 2 * (L + 4))

    def linear(kw, kb, fan_in, fan_out):
        lim = 1.0 / float(fan_in) ** 0.5
        return {
            "w": jax.random.uniform(kw, (fan_in, fan_out), jnp.float32, -lim, lim),
            "b": jax.random.uniform(kb, (fan_out,), jnp.float32, -lim, lim),
        }

    idx = 0
    backbone = []
    fan_in = input_size + hidden_size
    for _ in range(L):
        backbone.append(linear(keys[idx], keys[idx + 1], fan_in, BU))
        idx += 2
        fan_in = BU

    params = {"backbone": backbone}
    for name in ("ff1", "ff2", "time_a", "time_b"):
        params[name] = linear(keys[idx], keys[idx + 1], BU, hidden_size)
        idx += 2
    return params


# --------------------------- pure-JAX reference ---------------------------
def cfc_cell_reference(x, hx, ts, params, hparams):
    act = _ACT[hparams["backbone_activation"]]
    B = x.shape[0]
    ts = jnp.asarray(ts, jnp.float32).reshape(B, 1)
    h = jnp.concatenate([x, hx], axis=1)
    for layer in params["backbone"]:
        h = act(h @ layer["w"] + layer["b"])
    ff1 = jnp.tanh(h @ params["ff1"]["w"] + params["ff1"]["b"])
    ff2 = jnp.tanh(h @ params["ff2"]["w"] + params["ff2"]["b"])
    t_a = h @ params["time_a"]["w"] + params["time_a"]["b"]
    t_b = h @ params["time_b"]["w"] + params["time_b"]["b"]
    t_interp = jax.nn.sigmoid(t_a * ts + t_b)
    if hparams.get("no_gate", False):
        return ff1 + t_interp * ff2
    return ff1 * (1.0 - t_interp) + t_interp * ff2


if __name__ == "__main__":
    hparams = {
        "backbone_activation": "lecun",
        "backbone_units": 64,
        "backbone_layers": 2,
        "no_gate": False,
    }
    B, F, H, T = 2, 4, 32, 8

    key = jax.random.PRNGKey(0)
    k_p, k_x, k_h, k_t, k_xs, k_ts = jax.random.split(key, 6)

    params = init_params(k_p, F, H, hparams)
    packed = prepare_params(params, F, H, hparams)  # one-time host-side weight packing

    # ---- single-step cell ----
    x = jax.random.normal(k_x, (B, F), jnp.float32)
    hx = jax.random.normal(k_h, (B, H), jnp.float32) * 0.1
    ts = jax.random.uniform(k_t, (B,), jnp.float32, 0.5, 1.5)

    out = cfc_cell_forward(x, hx, ts, packed)
    jax.block_until_ready(out)
    ref = cfc_cell_reference(x, hx, ts, params, hparams)
    assert out.shape == (B, H)
    assert jnp.allclose(out, ref, rtol=2e-2, atol=2e-2), "step mismatch vs reference"

    # ---- fused multi-timestep rollout (weights stay VMEM-resident across T) ----
    xseq = jax.random.normal(k_xs, (T, B, F), jnp.float32)
    tsseq = jax.random.uniform(k_ts, (T, B), jnp.float32, 0.5, 1.5)

    out_seq = cfc_cell_sequence(xseq, hx, tsseq, packed)
    jax.block_until_ready(out_seq)

    h_ref = hx
    ref_seq = []
    for t in range(T):
        h_ref = cfc_cell_reference(xseq[t], h_ref, tsseq[t], params, hparams)
        ref_seq.append(h_ref)
    ref_seq = jnp.stack(ref_seq, axis=0)
    assert out_seq.shape == (T, B, H)
    assert jnp.allclose(out_seq, ref_seq, rtol=5e-2, atol=5e-2), "sequence mismatch vs reference"

    print("KERNEL_OK")
</pallas_src>

<mosaic_0001>
module attributes {stable_mosaic.version = 11 : i64} {
  func.func @kernel(%arg0: i32, %arg1: memref<8x128xbf16, #tpu.memory_space<vmem>>, %arg2: memref<8x128xf32, #tpu.memory_space<vmem>>, %arg3: memref<128x128xbf16, #tpu.memory_space<vmem>>, %arg4: memref<1x128xf32, #tpu.memory_space<vmem>>, %arg5: memref<128x128xbf16, #tpu.memory_space<vmem>>, %arg6: memref<1x128xf32, #tpu.memory_space<vmem>>, %arg7: memref<128x512xbf16, #tpu.memory_space<vmem>>, %arg8: memref<1x512xf32, #tpu.memory_space<vmem>>, %arg9: memref<8x128xf32, #tpu.memory_space<vmem>>) attributes {dimension_semantics = [#tpu.dimension_semantics<parallel>], iteration_bounds = array<i64: 1>, scalar_prefetch = 0 : i64, scratch_operands = 0 : i64, tpu.core_type = #tpu.core_type<tc>, window_params = [{transform_indices = @transform_0, window_bounds = array<i64: 8, 128>}, {transform_indices = @transform_1, window_bounds = array<i64: 8, 128>}, {pipeline_mode = #tpu.pipeline_mode<synchronous>, transform_indices = @transform_2, window_bounds = array<i64: 128, 128>}, {pipeline_mode = #tpu.pipeline_mode<synchronous>, transform_indices = @transform_3, window_bounds = array<i64: 1, 128>}, {pipeline_mode = #tpu.pipeline_mode<synchronous>, transform_indices = @transform_4, window_bounds = array<i64: 128, 128>}, {pipeline_mode = #tpu.pipeline_mode<synchronous>, transform_indices = @transform_5, window_bounds = array<i64: 1, 128>}, {pipeline_mode = #tpu.pipeline_mode<synchronous>, transform_indices = @transform_6, window_bounds = array<i64: 128, 512>}, {pipeline_mode = #tpu.pipeline_mode<synchronous>, transform_indices = @transform_7, window_bounds = array<i64: 1, 512>}, {transform_indices = @transform_8, window_bounds = array<i64: 8, 128>}]} {
    %c0 = arith.constant 0 : index
    %c0_0 = arith.constant 0 : index
    %0 = vector.load %arg1[%c0, %c0_0] : memref<8x128xbf16, #tpu.memory_space<vmem>>, vector<8x128xbf16>
    %c0_1 = arith.constant 0 : index
    %c0_2 = arith.constant 0 : index
    %1 = vector.load %arg3[%c0_1, %c0_2] : memref<128x128xbf16, #tpu.memory_space<vmem>>, vector<128x128xbf16>
    %cst = arith.constant dense<0.000000e+00> : vector<8x128xf32>
    %2 = tpu.matmul %0, %1, %cst {dimension_numbers = #tpu.dot_dimension_numbers<[1], [0], [0], [1], [0, 0, 1, 1], [], []>} : vector<8x128xbf16>, vector<128x128xbf16>, vector<8x128xf32> -> vector<8x128xf32>
    %c0_3 = arith.constant 0 : index
    %c0_4 = arith.constant 0 : index
    %3 = vector.load %arg4[%c0_3, %c0_4] : memref<1x128xf32, #tpu.memory_space<vmem>>, vector<1x128xf32>
    %4 = vector.broadcast %3 : vector<1x128xf32> to vector<8x128xf32>
    %5 = arith.addf %2, %4 : vector<8x128xf32>
    %cst_5 = arith.constant 6.660000e-01 : f32
    %6 = vector.broadcast %cst_5 : f32 to vector<8x128xf32>
    %7 = arith.mulf %6, %5 : vector<8x128xf32>
    %8 = math.tanh %7 : vector<8x128xf32>
    %cst_6 = arith.constant 1.715900e+00 : f32
    %9 = vector.broadcast %cst_6 : f32 to vector<8x128xf32>
    %10 = arith.mulf %9, %8 : vector<8x128xf32>
    %11 = arith.truncf %10 : vector<8x128xf32> to vector<8x128xbf16>
    %c0_7 = arith.constant 0 : index
    %c0_8 = arith.constant 0 : index
    %12 = vector.load %arg5[%c0_7, %c0_8] : memref<128x128xbf16, #tpu.memory_space<vmem>>, vector<128x128xbf16>
    %cst_9 = arith.constant dense<0.000000e+00> : vector<8x128xf32>
    %13 = tpu.matmul %11, %12, %cst_9 {dimension_numbers = #tpu.dot_dimension_numbers<[1], [0], [0], [1], [0, 0, 1, 1], [], []>} : vector<8x128xbf16>, vector<128x128xbf16>, vector<8x128xf32> -> vector<8x128xf32>
    %c0_10 = arith.constant 0 : index
    %c0_11 = arith.constant 0 : index
    %14 = vector.load %arg6[%c0_10, %c0_11] : memref<1x128xf32, #tpu.memory_space<vmem>>, vector<1x128xf32>
    %15 = vector.broadcast %14 : vector<1x128xf32> to vector<8x128xf32>
    %16 = arith.addf %13, %15 : vector<8x128xf32>
    %cst_12 = arith.constant 6.660000e-01 : f32
    %17 = vector.broadcast %cst_12 : f32 to vector<8x128xf32>
    %18 = arith.mulf %17, %16 : vector<8x128xf32>
    %19 = math.tanh %18 : vector<8x128xf32>
    %cst_13 = arith.constant 1.715900e+00 : f32
    %20 = vector.broadcast %cst_13 : f32 to vector<8x128xf32>
    %21 = arith.mulf %20, %19 : vector<8x128xf32>
    %22 = arith.truncf %21 : vector<8x128xf32> to vector<8x128xbf16>
    %c0_14 = arith.constant 0 : index
    %c0_15 = arith.constant 0 : index
    %23 = vector.load %arg7[%c0_14, %c0_15] : memref<128x512xbf16, #tpu.memory_space<vmem>>, vector<128x512xbf16>
    %cst_16 = arith.constant dense<0.000000e+00> : vector<8x512xf32>
    %24 = tpu.matmul %22, %23, %cst_16 {dimension_numbers = #tpu.dot_dimension_numbers<[1], [0], [0], [1], [0, 0, 1, 1], [], []>} : vector<8x128xbf16>, vector<128x512xbf16>, vector<8x512xf32> -> vector<8x512xf32>
    %c0_17 = arith.constant 0 : index
    %c0_18 = arith.constant 0 : index
    %25 = vector.load %arg8[%c0_17, %c0_18] : memref<1x512xf32, #tpu.memory_space<vmem>>, vector<1x512xf32>
    %26 = vector.broadcast %25 : vector<1x512xf32> to vector<8x512xf32>
    %27 = arith.addf %24, %26 : vector<8x512xf32>
    %28 = vector.extract_strided_slice %27 {offsets = [0, 0], sizes = [8, 128], strides = [1, 1]} : vector<8x512xf32> to vector<8x128xf32>
    %29 = math.tanh %28 : vector<8x128xf32>
    %30 = vector.extract_strided_slice %27 {offsets = [0, 128], sizes = [8, 128], strides = [1, 1]} : vector<8x512xf32> to vector<8x128xf32>
    %31 = math.tanh %30 : vector<8x128xf32>
    %32 = vector.extract_strided_slice %27 {offsets = [0, 256], sizes = [8, 128], strides = [1, 1]} : vector<8x512xf32> to vector<8x128xf32>
    %33 = vector.extract_strided_slice %27 {offsets = [0, 384], sizes = [8, 128], strides = [1, 1]} : vector<8x512xf32> to vector<8x128xf32>
    %c0_19 = arith.constant 0 : index
    %c0_20 = arith.constant 0 : index
    %34 = vector.load %arg2[%c0_19, %c0_20] : memref<8x128xf32, #tpu.memory_space<vmem>>, vector<8x128xf32>
    %35 = arith.mulf %32, %34 : vector<8x128xf32>
    %36 = arith.addf %35, %33 : vector<8x128xf32>
    %37 = arith.negf %36 : vector<8x128xf32>
    %38 = math.exp %37 : vector<8x128xf32>
    %cst_21 = arith.constant 1.000000e+00 : f32
    %39 = vector.broadcast %cst_21 : f32 to vector<8x128xf32>
    %40 = arith.addf %39, %38 : vector<8x128xf32>
    %41 = arith.divf %39, %40 : vector<8x128xf32>
    %cst_22 = arith.constant 1.000000e+00 : f32
    %42 = vector.broadcast %cst_22 : f32 to vector<8x128xf32>
    %43 = arith.subf %42, %41 : vector<8x128xf32>
    %44 = arith.mulf %29, %43 : vector<8x128xf32>
    %45 = arith.mulf %41, %31 : vector<8x128xf32>
    %46 = arith.addf %44, %45 : vector<8x128xf32>
    %c0_23 = arith.constant 0 : index
    %c0_24 = arith.constant 0 : index
    %47 = vector.load %arg9[%c0_23, %c0_24] : memref<8x128xf32, #tpu.memory_space<vmem>>, vector<8x128xf32>
    tpu.vector_store %arg9[%c0_23, %c0_24], %46 {strides = array<i32>} : memref<8x128xf32, #tpu.memory_space<vmem>>, vector<8x128xf32>,
    return
  }
  func.func @transform_0(%arg0: i32) -> (i32, i32) {
    %c0_i32 = arith.constant 0 : i32
    %c0_i32_0 = arith.constant 0 : i32
    return %arg0, %c0_i32 : i32, i32
  }
  func.func @transform_1(%arg0: i32) -> (i32, i32) {
    %c0_i32 = arith.constant 0 : i32
    %c0_i32_0 = arith.constant 0 : i32
    return %arg0, %c0_i32 : i32, i32
  }
  func.func @transform_2(%arg0: i32) -> (i32, i32) {
    %c0_i32 = arith.constant 0 : i32
    %c0_i32_0 = arith.constant 0 : i32
    %c0_i32_1 = arith.constant 0 : i32
    return %c0_i32, %c0_i32_0 : i32, i32
  }
  func.func @transform_3(%arg0: i32) -> (i32, i32) {
    %c0_i32 = arith.constant 0 : i32
    %c0_i32_0 = arith.constant 0 : i32
    %c0_i32_1 = arith.constant 0 : i32
    return %c0_i32, %c0_i32_0 : i32, i32
  }
  func.func @transform_4(%arg0: i32) -> (i32, i32) {
    %c0_i32 = arith.constant 0 : i32
    %c0_i32_0 = arith.constant 0 : i32
    %c0_i32_1 = arith.constant 0 : i32
    return %c0_i32, %c0_i32_0 : i32, i32
  }
  func.func @transform_5(%arg0: i32) -> (i32, i32) {
    %c0_i32 = arith.constant 0 : i32
    %c0_i32_0 = arith.constant 0 : i32
    %c0_i32_1 = arith.constant 0 : i32
    return %c0_i32, %c0_i32_0 : i32, i32
  }
  func.func @transform_6(%arg0: i32) -> (i32, i32) {
    %c0_i32 = arith.constant 0 : i32
    %c0_i32_0 = arith.constant 0 : i32
    %c0_i32_1 = arith.constant 0 : i32
    return %c0_i32, %c0_i32_0 : i32, i32
  }
  func.func @transform_7(%arg0: i32) -> (i32, i32) {
    %c0_i32 = arith.constant 0 : i32
    %c0_i32_0 = arith.constant 0 : i32
    %c0_i32_1 = arith.constant 0 : i32
    return %c0_i32, %c0_i32_0 : i32, i32
  }
  func.func @transform_8(%arg0: i32) -> (i32, i32) {
    %c0_i32 = arith.constant 0 : i32
    %c0_i32_0 = arith.constant 0 : i32
    return %arg0, %c0_i32 : i32, i32
  }
}

</mosaic_0001>

<bundles_post_ra>
// kernel: tpu_custom_call.1
= control target key start
LH: loop header
LB: loop body
LE: loop exit
PB: predicated region body
PF: predicated region fallthrough
CT: control target
= control target key end

     0   :  { %13 = vsyncpa [#allocation3], 0  ;;  %s1076_s0 = inlined_call_operand.hbm [shape: bf16[8,128], index: 0, kind: input, shape index: {}]   ;;  %s1077_s1 = inlined_call_operand.hbm [shape: f32[8,128], index: 1, kind: input, shape index: {}]   ;;  %s1078_s2 = inlined_call_operand.hbm [shape: bf16[128,128], index: 2, kind: input, shape index: {}]   ;;  %s1079_s3 = inlined_call_operand.vmem [shape: f32[1,128], index: 3, kind: input, shape index: {}]   ;;  %s1080_s4 = inlined_call_operand.hbm [shape: bf16[128,128], index: 4, kind: input, shape index: {}]   ;;  %s1081_s5 = inlined_call_operand.vmem [shape: f32[1,128], index: 5, kind: input, shape index: {}]   ;;  %s1082_s6 = inlined_call_operand.hbm [shape: bf16[128,512], index: 6, kind: input, shape index: {}]   ;;  %s1083_s7 = inlined_call_operand.vmem [shape: f32[1,512], index: 7, kind: input, shape index: {}]   ;;  %s1084_s8 = inlined_call_operand.hbm [shape: f32[8,128], index: 8, kind: output, shape index: {}]  }
   0x1   :  { %14 = vsyncpa [#allocation6], 0 }
   0x2   :  { %15 = vsyncpa [#allocation9], 0  ;;  %s33_s29 = sshll.u32 %s1077_s1, 4  ;;  %s34_s29 = int_to_ptr.hbm [resolvable:$true] %s33_s29 }
   0x3   :  { %16 = vsyncpa [#allocation4], 0  ;;  %s994_s30 = smov [#allocation5]   ;;  %s58_s12 = sshll.u32 %s1080_s4, 4  ;;  %s59_s12 = int_to_ptr.hbm [resolvable:$true] %s58_s12 }
   0x4   :  { %s35_s9 = sshll.u32 %s994_s30, 4  ;;  %s995_s13 = smov [#allocation8]   ;;  %s36_s9 = int_to_ptr.vmem [resolvable:$true] %s35_s9 }
   0x5   :  { %38 = dma.hbm_to_vmem [thread:$0]  %s34_s29, 128, %s36_s9, [#allocation6]  }
   0x6   :  { %s60_s14 = sshll.u32 %s995_s13, 4  ;;  %s22_s17 = sshll.u32 %s1076_s0, 4  ;;  %s61_s14 = int_to_ptr.vmem [resolvable:$true] %s60_s14  ;;  %s23_s17 = int_to_ptr.hbm [resolvable:$true] %s22_s17 }
   0x7   :  { %s996_s1 = smov 64   ;;  %s997_s18 = smov 4  }
   0x8   :  { %66 = dma.hbm_to_vmem [thread:$0]  %s59_s12, 1024, %s61_s14, [#allocation9], %s996_s1, %s996_s1, %s997_s18  }
   0x9   :  { %s43_s21 = sshll.u32 %s1078_s2, 4  ;;  %s998_s22 = smov [#allocation2]   ;;  %s44_s21 = int_to_ptr.hbm [resolvable:$true] %s43_s21 }
   0xa   :  { %s24_s23 = sshll.u32 %s998_s22, 4  ;;  %s999_s4 = smov [#allocation7]   ;;  %s25_s23 = int_to_ptr.vmem [resolvable:$true] %s24_s23 }
   0xb   :  { %27 = dma.hbm_to_vmem [thread:$0]  %s23_s17, 64, %s25_s23, [#allocation3]  }
   0xc   :  { %s45_s24 = sshll.u32 %s999_s4, 4  ;;  %s73_s0 = sshll.u32 %s1082_s6, 4  ;;  %s46_s24 = int_to_ptr.vmem [resolvable:$true] %s45_s24  ;;  %s74_s0 = int_to_ptr.hbm [resolvable:$true] %s73_s0 }
   0xd   :  { %51 = dma.hbm_to_vmem [thread:$0]  %s44_s21, 1024, %s46_s24, [#allocation6], %s996_s1, %s996_s1, %s997_s18  }
   0xe   :  { %s1000_s27 = smov [#allocation10]   ;;  %s1001_s29 = smov 256  }
   0xf   :  { %s75_s28 = sshll.u32 %s1000_s27, 4  ;;  %s1002_s30 = smov 16   ;;  %s76_s28 = int_to_ptr.vmem [resolvable:$true] %s75_s28 }
  0x10   :  { %81 = dma.hbm_to_vmem [thread:$0]  %s74_s0, 4096, %s76_s28, [#allocation9], %s1001_s29, %s1001_s29, %s1002_s30  }
  0x11   :  { %986 = dma.done.wait [#allocation3], 64  }
  0x12   :  { %987 = vsyncadd [#allocation3], 4294967232 }
  0x13   :  { %988 = dma.done.wait [#allocation6], 1152  }
  0x14   :  { %989 = vsyncadd [#allocation6], 4294966144 }
  0x15   :  { %990 = dma.done.wait [#allocation9], 5120  }
  0x16   :  { %991 = vsyncadd [#allocation9], 4294962176  ;;  %v777_v0 = vld [vmem:[#allocation7 + $0x38] sm:$0xff]  ;;  %v776_v1 = vld [vmem:[#allocation7 + $0x30] sm:$0xff]  ;;  %s565_s14 = sshll.u32 %s1084_s8, 4  ;;  %s566_s14 = int_to_ptr.hbm [resolvable:$true] %s565_s14 }
  0x17   :  { %173 = vmatpush.bf16.msra.mxu0 %v777_v0  ;;  %v785_v2 = vld [vmem:[#allocation8 + $0x38] sm:$0xff]  ;;  %v784_v3 = vld [vmem:[#allocation8 + $0x30] sm:$0xff]  ;;  %v775_v4 = vld [vmem:[#allocation7 + $0x28] sm:$0xff] }
  0x18   :  { %258 = vmatpush.bf16.msra.mxu1 %v785_v2  ;;  %v783_v5 = vld [vmem:[#allocation8 + $0x28] sm:$0xff]  ;;  %v774_v6 = vld [vmem:[#allocation7 + $0x20] sm:$0xff]  ;;  %v773_v8 = vld [vmem:[#allocation7 + $0x18] sm:$0xff] }
  0x19   :  { %v782_v7 = vld [vmem:[#allocation8 + $0x20] sm:$0xff]  ;;  %v772_v9 = vld [vmem:[#allocation7 + $0x10] sm:$0xff]  ;;  %v771_v10 = vld [vmem:[#allocation7 + $0x8] sm:$0xff] }
  0x1a   :  { %v770_v11 = vld [vmem:[#allocation7] sm:$0xff]  ;;  %v104_v12 = vld [vmem:[#allocation2] sm:$0xf]  ;;  %v781_v13 = vld [vmem:[#allocation8 + $0x18] sm:$0xff] }
  0x1b   :  { %174 = vmatpush.bf16.msra.mxu0 %v776_v1  ;;  %v780_v14 = vld [vmem:[#allocation8 + $0x10] sm:$0xff]  ;;  %v779_v15 = vld [vmem:[#allocation8 + $0x8] sm:$0xff]  ;;  %v778_v16 = vld [vmem:[#allocation8] sm:$0xff] }
  0x1c   :  { %259 = vmatpush.bf16.msra.mxu1 %v784_v3  ;;  %v755_v17 = vld [vmem:[#allocation10 + $0xe0] sm:$0xf]  ;;  %v816_v18 = vld [vmem:[#allocation10 + $0xec] sm:$0xf0]  ;;  %v814_v19 = vld [vmem:[#allocation10 + $0xe4] sm:$0xf] }
  0x1d   :  { %v756_v20 = vor.u32 %v816_v18, %v755_v17  ;;  %v757_v21 = vld [vmem:[#allocation10 + $0xf0] sm:$0xf0]  ;;  %v763_v22 = vld [vmem:[#allocation10 + $0xe8] sm:$0xf]  ;;  %v817_v23 = vld [vmem:[#allocation10 + $0xf4] sm:$0xf0] }
  0x1e   :  { %v760_v24 = vor.u32 %v814_v19, %v757_v21  ;;  %v764_v25 = vor.u32 %v817_v23, %v763_v22  ;;  %v815_v26 = vld [vmem:[#allocation10 + $0xec] sm:$0xf]  ;;  %v765_v27 = vld [vmem:[#allocation10 + $0xf8] sm:$0xf0]  ;;  %v739_v28 = vld [vmem:[#allocation10 + $0xc0] sm:$0xf] }
  0x1f   :  { %175 = vmatpush.bf16.msra.mxu0 %v775_v4  ;;  %477 = vmatpush.bf16.msra.mxu2 %v756_v20  ;;  %v768_v29 = vor.u32 %v815_v26, %v765_v27  ;;  %v812_v30 = vld [vmem:[#allocation10 + $0xcc] sm:$0xf0]  ;;  %v810_v31 = vld [vmem:[#allocation10 + $0xc4] sm:$0xf]  ;;  %v741_v32 = vld [vmem:[#allocation10 + $0xd0] sm:$0xf0] }
  0x20   :  { %260 = vmatpush.bf16.msra.mxu1 %v783_v5  ;;  %490 = vmatpush.bf16.msra.mxu3 %v760_v24  ;;  %v740_v33 = vor.u32 %v812_v30, %v739_v28  ;;  %v744_v34 = vor.u32 %v810_v31, %v741_v32  ;;  %v747_v35 = vld [vmem:[#allocation10 + $0xc8] sm:$0xf]  ;;  %v813_v36 = vld [vmem:[#allocation10 + $0xd4] sm:$0xf0]  ;;  %v811_v37 = vld [vmem:[#allocation10 + $0xcc] sm:$0xf] }
  0x21   :  { %v748_v38 = vor.u32 %v813_v36, %v747_v35  ;;  %v749_v39 = vld [vmem:[#allocation10 + $0xd8] sm:$0xf0]  ;;  %v723_v40 = vld [vmem:[#allocation10 + $0xa0] sm:$0xf]  ;;  %v808_v41 = vld [vmem:[#allocation10 + $0xac] sm:$0xf0] }
  0x22   :  { %v752_v42 = vor.u32 %v811_v37, %v749_v39  ;;  %v806_v43 = vld [vmem:[#allocation10 + $0xa4] sm:$0xf]  ;;  %v725_v44 = vld [vmem:[#allocation10 + $0xb0] sm:$0xf0]  ;;  %v731_v45 = vld [vmem:[#allocation10 + $0xa8] sm:$0xf]  ;;  %v724_v46 = vor.u32 %v808_v41, %v723_v40 }
  0x23   :  { %176 = vmatpush.bf16.msra.mxu0 %v774_v6  ;;  %478 = vmatpush.bf16.msra.mxu2 %v740_v33  ;;  %v809_v47 = vld [vmem:[#allocation10 + $0xb4] sm:$0xf0]  ;;  %v807_v48 = vld [vmem:[#allocation10 + $0xac] sm:$0xf]  ;;  %v733_v49 = vld [vmem:[#allocation10 + $0xb8] sm:$0xf0]  ;;  %v728_v50 = vor.u32 %v806_v43, %v725_v44 }
  0x24   :  { %261 = vmatpush.bf16.msra.mxu1 %v782_v7  ;;  %491 = vmatpush.bf16.msra.mxu3 %v744_v34  ;;  %v732_v51 = vor.u32 %v809_v47, %v731_v45  ;;  %v707_v52 = vld [vmem:[#allocation10 + $0x80] sm:$0xf]  ;;  %v804_v53 = vld [vmem:[#allocation10 + $0x8c] sm:$0xf0]  ;;  %v802_v54 = vld [vmem:[#allocation10 + $0x84] sm:$0xf]  ;;  %v736_v55 = vor.u32 %v807_v48, %v733_v49 }
  0x25   :  { %v709_v56 = vld [vmem:[#allocation10 + $0x90] sm:$0xf0]  ;;  %v715_v57 = vld [vmem:[#allocation10 + $0x88] sm:$0xf]  ;;  %v805_v58 = vld [vmem:[#allocation10 + $0x94] sm:$0xf0]  ;;  %v708_v61 = vor.u32 %v804_v53, %v707_v52 }
  0x26   :  { %v803_v59 = vld [vmem:[#allocation10 + $0x8c] sm:$0xf]  ;;  %v717_v60 = vld [vmem:[#allocation10 + $0x98] sm:$0xf0]  ;;  %v712_v62 = vor.u32 %v802_v54, %v709_v56  ;;  %v716_v63 = vor.u32 %v805_v58, %v715_v57  ;;  %v828_v0 = vld [vmem:[%s1079_s3] ss:$0 sm:$0xff] }
  0x27   :  { %177 = vmatpush.bf16.msra.mxu0 %v773_v8  ;;  %479 = vmatpush.bf16.msra.mxu2 %v724_v46  ;;  %v720_v1 = vor.u32 %v803_v59, %v717_v60  ;;  %v799_v18 = vld [vmem:[#allocation10 + $0x6c] sm:$0xf]  ;;  %v701_v19 = vld [vmem:[#allocation10 + $0x78] sm:$0xf0]  ;;  %v675_v21 = vld [vmem:[#allocation10 + $0x40] sm:$0xf] }
  0x28   :  { %262 = vmatpush.bf16.msra.mxu1 %v781_v13  ;;  %492 = vmatpush.bf16.msra.mxu3 %v728_v50  ;;  %v693_v13 = vld [vmem:[#allocation10 + $0x70] sm:$0xf0]  ;;  %v704_v20 = vor.u32 %v799_v18, %v701_v19  ;;  %v796_v22 = vld [vmem:[#allocation10 + $0x4c] sm:$0xf0]  ;;  %v794_v23 = vld [vmem:[#allocation10 + $0x44] sm:$0xf] }
  0x29   :  { %v676_v24 = vor.u32 %v796_v22, %v675_v21  ;;  %v683_v26 = vld [vmem:[#allocation10 + $0x48] sm:$0xf]  ;;  %v797_v27 = vld [vmem:[#allocation10 + $0x54] sm:$0xf0]  ;;  %v795_v30 = vld [vmem:[#allocation10 + $0x4c] sm:$0xf] }
  0x2a   :  { %v685_v31 = vld [vmem:[#allocation10 + $0x58] sm:$0xf0]  ;;  %v659_v33 = vld [vmem:[#allocation10 + $0x20] sm:$0xf]  ;;  %v792_v34 = vld [vmem:[#allocation10 + $0x2c] sm:$0xf0] }
  0x2b   :  { %178 = vmatpush.bf16.msra.mxu0 %v772_v9  ;;  %480 = vmatpush.bf16.msra.mxu2 %v708_v61  ;;  %v691_v9 = vld [vmem:[#allocation10 + $0x60] sm:$0xf]  ;;  %v688_v32 = vor.u32 %v795_v30, %v685_v31  ;;  %v790_v35 = vld [vmem:[#allocation10 + $0x24] sm:$0xf]  ;;  %v660_v36 = vor.u32 %v792_v34, %v659_v33  ;;  %v661_v37 = vld [vmem:[#allocation10 + $0x30] sm:$0xf0] }
  0x2c   :  { %263 = vmatpush.bf16.msra.mxu1 %v780_v14  ;;  %493 = vmatpush.bf16.msra.mxu3 %v712_v62  ;;  %v699_v14 = vld [vmem:[#allocation10 + $0x68] sm:$0xf]  ;;  %v793_v39 = vld [vmem:[#allocation10 + $0x34] sm:$0xf0]  ;;  %v664_v40 = vor.u32 %v790_v35, %v661_v37  ;;  %v669_v43 = vld [vmem:[#allocation10 + $0x38] sm:$0xf0] }
  0x2d   :  { %v643_v45 = vld [vmem:[#allocation10] sm:$0xf]  ;;  %v788_v46 = vld [vmem:[#allocation10 + $0xc] sm:$0xf0]  ;;  %v786_v47 = vld [vmem:[#allocation10 + $0x4] sm:$0xf] }
  0x2e   :  { %v644_v48 = vor.u32 %v788_v46, %v643_v45  ;;  %v645_v49 = vld [vmem:[#allocation10 + $0x10] sm:$0xf0]  ;;  %v651_v50 = vld [vmem:[#allocation10 + $0x8] sm:$0xf]  ;;  %v787_v54 = vld [vmem:[#allocation10 + $0xc] sm:$0xf] }
  0x2f   :  { %179 = vmatpush.bf16.msra.mxu0 %v771_v10  ;;  %v800_v10 = vld [vmem:[#allocation10 + $0x6c] sm:$0xf0]  ;;  %v648_v52 = vor.u32 %v786_v47, %v645_v49  ;;  %v829_v57 = vld [vmem:[%s1081_s5] ss:$0 sm:$0xff]  ;;  %s1003_s5 = smov [#allocation11]  }
  0x30   :  { %264 = vmatpush.bf16.msra.mxu1 %v779_v15  ;;  %v801_v15 = vld [vmem:[#allocation10 + $0x74] sm:$0xf0] }
  0x31   :  { %v700_v17 = vor.u32 %v801_v15, %v699_v14 }
  0x33   :  { %180 = vmatpush.bf16.msra.mxu0 %v770_v11  ;;  %v798_v11 = vld [vmem:[#allocation10 + $0x64] sm:$0xf] }
  0x34   :  { %265 = vmatpush.bf16.msra.mxu1 %v778_v16  ;;  %v696_v16 = vor.u32 %v798_v11, %v693_v13 }
  0x36   :  { %181 = vmatmul.bf16.vlgmr.msra.gmra.mxu0 %v104_v12  ;;  %v692_v12 = vor.u32 %v800_v10, %v691_v9  ;;  %494 = vmatpush.bf16.msra.mxu3 %v696_v16 }
  0x37   :  { %503 = vmatpush.bf16.msrb.mxu0 %v764_v25  ;;  %v677_v25 = vld [vmem:[#allocation10 + $0x50] sm:$0xf0] }
  0x38   :  { %516 = vmatpush.bf16.msrb.mxu1 %v768_v29  ;;  %481 = vmatpush.bf16.msra.mxu2 %v692_v12  ;;  %v680_v28 = vor.u32 %v794_v23, %v677_v25  ;;  %v684_v29 = vor.u32 %v797_v27, %v683_v26 }
  0x3a   :  { %495 = vmatpush.bf16.msra.mxu3 %v680_v28 }
  0x3b   :  { %504 = vmatpush.bf16.msrb.mxu0 %v748_v38  ;;  %v667_v38 = vld [vmem:[#allocation10 + $0x28] sm:$0xf] }
  0x3c   :  { %517 = vmatpush.bf16.msrb.mxu1 %v752_v42  ;;  %482 = vmatpush.bf16.msra.mxu2 %v676_v24  ;;  %v668_v41 = vor.u32 %v793_v39, %v667_v38  ;;  %v791_v42 = vld [vmem:[#allocation10 + $0x2c] sm:$0xf] }
  0x3d   :  { %v672_v44 = vor.u32 %v791_v42, %v669_v43 }
  0x3e   :  { %496 = vmatpush.bf16.msra.mxu3 %v664_v40 }
  0x3f   :  { %505 = vmatpush.bf16.msrb.mxu0 %v732_v51  ;;  %v789_v51 = vld [vmem:[#allocation10 + $0x14] sm:$0xf0] }
  0x40   :  { %518 = vmatpush.bf16.msrb.mxu1 %v736_v55  ;;  %483 = vmatpush.bf16.msra.mxu2 %v660_v36  ;;  %v652_v53 = vor.u32 %v789_v51, %v651_v50  ;;  %v653_v55 = vld [vmem:[#allocation10 + $0x18] sm:$0xf0] }
  0x41   :  { %v656_v56 = vor.u32 %v787_v54, %v653_v55 }
  0x42   :  { %497 = vmatpush.bf16.msra.mxu3 %v648_v52 }
  0x43   :  { %506 = vmatpush.bf16.msrb.mxu0 %v716_v63 }
  0x44   :  { %519 = vmatpush.bf16.msrb.mxu1 %v720_v1  ;;  %484 = vmatpush.bf16.msra.mxu2 %v644_v48  ;;  %v307_v1 = vld [vmem:[%s1083_s7] sm:$0xf]  ;;  %s563_s7 = sshll.u32 %s1003_s5, 4  ;;  %s564_s7 = int_to_ptr.vmem [resolvable:$true] %s563_s7 }
  0x45   :  { %v310_v21 = vperm.slane %v307_v1, 1 }
  0x47   :  { %507 = vmatpush.bf16.msrb.mxu0 %v700_v17 }
  0x48   :  { %520 = vmatpush.bf16.msrb.mxu1 %v704_v20  ;;  %v309_v20 = vperm.slane %v307_v1, 0 }
  0x4b   :  { %508 = vmatpush.bf16.msrb.mxu0 %v684_v29 }
  0x4c   :  { %521 = vmatpush.bf16.msrb.mxu1 %v688_v32 }
  0x4f   :  { %509 = vmatpush.bf16.msrb.mxu0 %v668_v41 }
  0x50   :  { %522 = vmatpush.bf16.msrb.mxu1 %v672_v44 }
  0x53   :  { %510 = vmatpush.bf16.msrb.mxu0 %v652_v53 }
  0x54   :  { %523 = vmatpush.bf16.msrb.mxu1 %v656_v56 }
  0xb3   :  { %v182_v2 = vpop.f32.mrf.mxu0 }
  0xb4   :  { %v183_v3 = vadd.f32 %v828_v0, %v182_v2  ;;  %v311_v2 = vperm.slane %v307_v1, 2 }
  0xb6   :  { %v186_v4 = vmul.f32 0.666, %v183_v3  ;;  %v312_v3 = vperm.slane %v307_v1, 3 }
  0xb8   :  { %830 = vtanh.f32 %v186_v4 }
  0xbb   :  { %v184_v5 = vpop.f32.mrf.mxu0 }
  0xbc   :  { %v531_v5 = vld [vmem:[#allocation5] sm:$0xff] }
  0xbe   :  { %v831_v6 = vpop.eup %830 }
  0xbf   :  { %v188_v7 = vmul.f32 1.7159, %v831_v6 }
  0xc1   :  { %v189_v8 = vpack.c.bf16 %v188_v7, %v188_v7 }
  0xc3   :  { %266 = vmatmul.bf16.vlgmr.msra.gmra.mxu1 %v189_v8 }
 0x140   :  { %v267_v58 = vpop.f32.mrf.mxu1 }
 0x141   :  { %v268_v59 = vadd.f32 %v829_v57, %v267_v58 }
 0x143   :  { %v271_v60 = vmul.f32 0.666, %v268_v59 }
 0x145   :  { %832 = vtanh.f32 %v271_v60 }
 0x148   :  { %v269_v61 = vpop.f32.mrf.mxu1 }
 0x14b   :  { %v833_v62 = vpop.eup %832 }
 0x14c   :  { %v273_v63 = vmul.f32 1.7159, %v833_v62 }
 0x14e   :  { %v274_v0 = vpack.c.bf16 %v273_v63, %v273_v63 }
 0x150   :  { %485 = vmatmul.bf16.vlgmr.msra.gmra.mxu2 %v274_v0  ;;  %498 = vmatmul.bf16.vlgmr.msra.gmra.mxu3 %v274_v0 }
 0x151   :  { %511 = vmatmul.bf16.vlgmr.msrb.gmra.mxu0 %v274_v0  ;;  %524 = vmatmul.bf16.vlgmr.msrb.gmra.mxu1 %v274_v0 }
 0x1ce   :  { %v512_v4 = vpop.f32.mrf.mxu0  ;;  %v525_v6 = vpop.f32.mrf.mxu1 }
 0x1cf   :  { %v513_v7 = vadd.f32 %v512_v4, %v311_v2  ;;  %v526_v9 = vadd.f32 %v525_v6, %v312_v3 }
 0x1d1   :  { %v532_v8 = vmul.f32 %v531_v5, %v513_v7 }
 0x1d3   :  { %v533_v10 = vadd.f32 %v532_v8, %v526_v9  ;;  %v486_v11 = vpop.f32.mrf.mxu2  ;;  %v499_v12 = vpop.f32.mrf.mxu3 }
 0x1d4   :  { %v487_v24 = vadd.f32 %v486_v11, %v309_v20  ;;  %v500_v25 = vadd.f32 %v499_v12, %v310_v21 }
 0x1d5   :  { %v769_v13 = vmul.f32 -1.442695, %v533_v10 }
 0x1d6   :  { %v514_v14 = vpop.f32.mrf.mxu0  ;;  %v527_v15 = vpop.f32.mrf.mxu1 }
 0x1d7   :  { %834 = vpow2.f32 %v769_v13 }
 0x1db   :  { %v488_v16 = vpop.f32.mrf.mxu2  ;;  %v501_v17 = vpop.f32.mrf.mxu3 }
 0x1dd   :  { %v835_v18 = vpop.eup %834 }
 0x1de   :  { %v537_v19 = vadd.f32 1.0, %v835_v18 }
 0x1e0   :  { %836 = vrcp.f32 %v537_v19  ;;  %v549_v27 = vand.u32 2147483648, %v537_v19  ;;  %v547_v29 = vand.u32 2147483647, %v537_v19  ;;  %vm543_vm1 = vweird.f32 %v537_v19 }
 0x1e1   :  { %838 = vtanh.f32 %v487_v24 }
 0x1e2   :  { %840 = vtanh.f32 %v500_v25  ;;  %v550_v31 = vor.u32 1.1754944e-38, %v549_v27  ;;  %vm548_vm3 = vcmp.eq.f32.partialorder %v547_v29, 8.507059e+37 }
 0x1e6   :  { %v837_v22 = vpop.eup %836 }
 0x1e7   :  { %v539_v23 = vmul.f32 %v837_v22, %v537_v19  ;;  %vm544_vm0 = vweird.f32 %v837_v22  ;;  %v839_v34 = vpop.eup %838 }
 0x1e8   :  { %vm545_vm2 = vmor %vm543_vm1, %vm544_vm0  ;;  %v841_v36 = vpop.eup %840 }
 0x1e9   :  { %v540_v26 = vsub.f32 1.0, %v539_v23 }
 0x1eb   :  { %v541_v28 = vmul.f32 %v837_v22, %v540_v26 }
 0x1ed   :  { %v542_v30 = vadd.f32 %v837_v22, %v541_v28 }
 0x1ef   :  { %v546_v32 = vsel %vm545_vm2, %v837_v22, %v542_v30 }
 0x1f0   :  { %v551_v33 = vsel %vm548_vm3, %v550_v31, %v546_v32 }
 0x1f1   :  { %v553_v35 = vsub.f32 1.0, %v551_v33  ;;  %v555_v38 = vmul.f32 %v841_v36, %v551_v33 }
 0x1f3   :  { %v554_v37 = vmul.f32 %v839_v34, %v553_v35 }
 0x1f5   :  { %v556_v39 = vadd.f32 %v555_v38, %v554_v37 }
 0x1f7   :  { %557 = vst [vmem:[#allocation11] sm:$0xff] %v556_v39 }
 0x1f8   :  { %568 = dma.vmem_to_hbm [thread:$0]  %s564_s7, 128, %s566_s14, [#allocation4]  }
 0x1f9   :  { %992 = dma.done.wait [#allocation4], 128  }
 0x1fa   :  { %993 = vsyncadd [#allocation4], 4294967168 }
 0x1fb   :  { %573 = vsyncpa [#allocation3], 1 }
 0x1fc   :  { %574 = vsyncpa [#allocation6], 1 }
 0x1fd   :  { %575 = vsyncpa [#allocation9], 1 }
 0x1fe   :  { %576 = vsyncpa [#allocation4], 1 }

</bundles_post_ra>
